<compile_context>
chip_gen: v6e
topology: v6e:2x2x1
jax: 0.10.0
libtpu: 0.0.40
codegen_flags: <defaults>
</compile_context>

<pallas_src>
import functools

import jax
import jax.numpy as jnp
from jax import lax
from jax.experimental import pallas as pl
from jax.experimental.pallas import tpu as pltpu


def _round_up(x, m):
    return ((x + m - 1) // m) * m


def _mlp_tagger_kernel(idx_ref, fused_ref, b1_ref, w2_ref, b2_ref, out_ref,
                       oh_ref, *, window, wseg, pseg):
    """One row-tile: build concatenated one-hot -> single MXU matmul -> MLP head.

    idx_ref   : [tile_m, idx_cols] int32  (cols 0:w words, w:2w prefixes, 2w:3w suffixes)
    fused_ref : [window*(wseg+pseg), hidden] bf16   (embedding tables folded into W1)
    oh_ref    : [tile_m, window*(wseg+pseg)] bf16 VMEM scratch (one-hot features)
    out_ref   : [tile_m, out_dim] f32 (compact, no lane padding)
    """
    tile_m = idx_ref.shape[0]
    word_iota = lax.broadcasted_iota(jnp.int32, (tile_m, wseg), 1)
    pref_iota = lax.broadcasted_iota(jnp.int32, (tile_m, pseg), 1)

    # Static 5-way unroll over window positions; each segment is written to its
    # 128-aligned slot of the concatenated one-hot scratch.
    for w in range(window):
        base = w * (wseg + pseg)
        x_idx = idx_ref[:, w:w + 1]
        p_idx = idx_ref[:, window + w:window + w + 1]
        s_idx = idx_ref[:, 2 * window + w:2 * window + w + 1]
        oh_ref[:, base:base + wseg] = (word_iota == x_idx).astype(jnp.bfloat16)
        # Original module uses prefix_embeddings for BOTH prefixes and suffixes,
        # so their one-hots share the same fused-prefix segment (values 0/1/2,
        # exact in bf16).
        oh_ref[:, base + wseg:base + wseg + pseg] = (
            (pref_iota == p_idx).astype(jnp.bfloat16)
            + (pref_iota == s_idx).astype(jnp.bfloat16))

    # linear1 (embedding gather + sum + W1 all fused into one bf16 matmul) + tanh
    acc = jnp.dot(oh_ref[...], fused_ref[...], preferred_element_type=jnp.float32)
    h = jnp.tanh(acc + b1_ref[...])

    # F.dropout(x, training=self.training): identity in eval mode.
    # TODO(synk): training-mode dropout (stochastic mask via pltpu.prng_*) not emitted.

    # linear2 (tiny f32 matmul, K=hidden, N=out_dim)
    logits = jnp.dot(h, w2_ref[...], preferred_element_type=jnp.float32) + b2_ref[...]

    # numerically-stable log_softmax along the last (compact) dim
    m = jnp.max(logits, axis=-1, keepdims=True)
    z = logits - m
    lse = jnp.log(jnp.sum(jnp.exp(z), axis=-1, keepdims=True))
    out_ref[...] = z - lse


def mlp_tagger_forward(x, prefixes, suffixes, params, *, tile_m=1024):
    """x, prefixes, suffixes: int32 [N, window] index tensors."""
    wtab = params["embedding"].astype(jnp.float32)
    ptab = params["prefix_embeddings"].astype(jnp.float32)
    wvocab, emb_dim = wtab.shape
    pvocab = ptab.shape[0]
    n, window = x.shape
    hidden = params["w1"].shape[0]
    out_dim = params["w2"].shape[0]

    # Clamp indices (matches JAX gather semantics; note suffixes go through the
    # PREFIX table, mirroring the original module).
    x = jnp.clip(x.astype(jnp.int32), 0, wvocab - 1)
    prefixes = jnp.clip(prefixes.astype(jnp.int32), 0, pvocab - 1)
    suffixes = jnp.clip(suffixes.astype(jnp.int32), 0, pvocab - 1)

    # --- Fold embedding tables into W1, per window position, then concatenate
    # along K with each vocab segment padded to a 128-lane boundary. ---------
    w1t = params["w1"].astype(jnp.float32).T.reshape(window, emb_dim, hidden)
    wseg = _round_up(wvocab, 128)
    pseg = _round_up(pvocab, 128)
    k_total = window * (wseg + pseg)
    segs = []
    for w in range(window):
        fw = wtab @ w1t[w]   # [wvocab, hidden]
        fp = ptab @ w1t[w]   # [pvocab, hidden] (shared by prefix AND suffix)
        segs.append(jnp.pad(fw, ((0, wseg - wvocab), (0, 0))))
        segs.append(jnp.pad(fp, ((0, pseg - pvocab), (0, 0))))
    fused = jnp.concatenate(segs, axis=0).astype(jnp.bfloat16)  # [k_total, hidden]

    b1 = params["b1"].astype(jnp.float32).reshape(1, hidden)
    w2 = params["w2"].astype(jnp.float32).T                     # [hidden, out_dim]
    b2 = params["b2"].astype(jnp.float32).reshape(1, out_dim)

    # --- Pack the three index streams into one int32 array (one DMA/tile). ---
    idx_cols = _round_up(3 * window, 8)
    idx = jnp.concatenate([x, prefixes, suffixes], axis=1)
    if idx_cols != 3 * window:
        idx = jnp.pad(idx, ((0, 0), (0, idx_cols - 3 * window)))

    # --- Row tiling: multiples of 8; keep >=4 grid steps when N allows so the
    # grid shards across v7x's two TensorCores and the pipeline overlaps. -----
    tile_m = max(8, min(_round_up(tile_m, 8), _round_up(-(-n // 4), 8)))
    n_pad = _round_up(n, tile_m)
    if n_pad != n:
        idx = jnp.pad(idx, ((0, n_pad - n), (0, 0)))   # row 0 indices: valid, sliced off
    grid = (n_pad // tile_m,)

    kernel = functools.partial(_mlp_tagger_kernel,
                               window=window, wseg=wseg, pseg=pseg)

    flops = 2 * n_pad * (k_total * hidden + hidden * out_dim)
    transcendentals = n_pad * (hidden + out_dim)
    bytes_accessed = (n_pad * (idx_cols + out_dim) * 4
                      + k_total * hidden * 2
                      + (hidden + hidden * out_dim + out_dim) * 4)

    out = pl.pallas_call(
        kernel,
        out_shape=jax.ShapeDtypeStruct((n_pad, out_dim), jnp.float32),
        grid_spec=pltpu.PrefetchScalarGridSpec(
            num_scalar_prefetch=0,
            grid=grid,
            in_specs=[
                pl.BlockSpec((tile_m, idx_cols), lambda i: (i, 0)),   # packed indices
                pl.BlockSpec((k_total, hidden), lambda i: (0, 0)),    # fused tables (resident)
                pl.BlockSpec((1, hidden), lambda i: (0, 0)),          # b1
                pl.BlockSpec((hidden, out_dim), lambda i: (0, 0)),    # W2^T
                pl.BlockSpec((1, out_dim), lambda i: (0, 0)),         # b2
            ],
            out_specs=pl.BlockSpec((tile_m, out_dim), lambda i: (i, 0)),
            scratch_shapes=[pltpu.VMEM((tile_m, k_total), jnp.bfloat16)],
        ),
        compiler_params=pltpu.CompilerParams(
            dimension_semantics=("parallel",)),
        cost_estimate=pl.CostEstimate(
            flops=flops, transcendentals=transcendentals,
            bytes_accessed=bytes_accessed),
    )(idx, fused, b1, w2, b2)

    return out[:n]


def mlp_tagger_reference(x, prefixes, suffixes, params):
    """Pure-JAX f32 reference matching the PyTorch forward (eval mode)."""
    emb_dim = params["embedding"].shape[1]
    feat = emb_dim * x.shape[1]
    xe = params["embedding"][x].reshape(-1, feat).astype(jnp.float32)
    pe = params["prefix_embeddings"][prefixes].reshape(-1, feat).astype(jnp.float32)
    se = params["prefix_embeddings"][suffixes].reshape(-1, feat).astype(jnp.float32)
    h = jnp.tanh((pe + xe + se) @ params["w1"].T + params["b1"])
    logits = h @ params["w2"].T + params["b2"]
    return jax.nn.log_softmax(logits, axis=-1)


def init_params(key, words_vocab, prefix_vocab, suffix_vocab,
                hidden_layer_size, output_size, embedding_dim=50, window_size=5):
    ks = jax.random.split(key, 7)
    feat = embedding_dim * window_size
    # nn.Embedding: N(0,1); nn.Linear: U(-1/sqrt(fan_in), 1/sqrt(fan_in))
    lin1_bound = 1.0 / jnp.sqrt(feat)
    lin2_bound = 1.0 / jnp.sqrt(hidden_layer_size)
    return {
        "embedding": jax.random.normal(ks[0], (words_vocab, embedding_dim), jnp.float32),
        "prefix_embeddings": jax.random.normal(ks[1], (prefix_vocab, embedding_dim), jnp.float32),
        "suffix_embeddings": jax.random.normal(ks[2], (suffix_vocab, embedding_dim), jnp.float32),
        "w1": jax.random.uniform(ks[3], (hidden_layer_size, feat), jnp.float32,
                                 -lin1_bound, lin1_bound),
        "b1": jax.random.uniform(ks[4], (hidden_layer_size,), jnp.float32,
                                 -lin1_bound, lin1_bound),
        "w2": jax.random.uniform(ks[5], (output_size, hidden_layer_size), jnp.float32,
                                 -lin2_bound, lin2_bound),
        "b2": jax.random.uniform(ks[6], (output_size,), jnp.float32,
                                 -lin2_bound, lin2_bound),
    }


if __name__ == "__main__":
    key = jax.random.PRNGKey(0)
    pkey, xkey, prekey, sufkey = jax.random.split(key, 4)

    words_vocab, prefix_vocab, suffix_vocab = 100, 60, 70
    hidden_layer_size, output_size = 32, 16
    embedding_dim, window_size = 50, 5
    n_tokens = 8

    params = init_params(pkey, words_vocab, prefix_vocab, suffix_vocab,
                         hidden_layer_size, output_size, embedding_dim, window_size)

    x = jax.random.randint(xkey, (n_tokens, window_size), 0, words_vocab, jnp.int32)
    prefixes = jax.random.randint(prekey, (n_tokens, window_size), 0, prefix_vocab, jnp.int32)
    # The original module looks suffixes up in prefix_embeddings, so valid
    # suffix indices must lie in the prefix vocab range.
    suffixes = jax.random.randint(sufkey, (n_tokens, window_size), 0, prefix_vocab, jnp.int32)

    out = mlp_tagger_forward(x, prefixes, suffixes, params)
    out = jax.block_until_ready(out)
    ref = mlp_tagger_reference(x, prefixes, suffixes, params)

    assert out.shape == (n_tokens, output_size)
    # log_softmax rows should sum to ~1 in probability space
    assert jnp.allclose(jnp.sum(jnp.exp(out), axis=-1), 1.0, atol=1e-4)
    # fused table is bf16 (~2^-9 relative rounding on weights) -> relaxed but
    # still tight tolerance against the pure-f32 reference.
    assert jnp.allclose(out, ref, atol=1e-2, rtol=1e-2)
    print("KERNEL_OK")
</pallas_src>

<mosaic_0001>
module attributes {stable_mosaic.version = 11 : i64} {
  func.func @_mlp_tagger_kernel(%arg0: i32, %arg1: memref<8x16xi32, #tpu.memory_space<vmem>>, %arg2: memref<1280x32xbf16, #tpu.memory_space<vmem>>, %arg3: memref<1x32xf32, #tpu.memory_space<vmem>>, %arg4: memref<32x16xf32, #tpu.memory_space<vmem>>, %arg5: memref<1x16xf32, #tpu.memory_space<vmem>>, %arg6: memref<8x16xf32, #tpu.memory_space<vmem>>, %arg7: memref<8x1280xbf16, #tpu.memory_space<vmem>>) attributes {dimension_semantics = [#tpu.dimension_semantics<parallel>], iteration_bounds = array<i64: 1>, scalar_prefetch = 0 : i64, scratch_operands = 1 : i64, tpu.core_type = #tpu.core_type<tc>, window_params = [{transform_indices = @transform_0, window_bounds = array<i64: 8, 16>}, {pipeline_mode = #tpu.pipeline_mode<synchronous>, transform_indices = @transform_1, window_bounds = array<i64: 1280, 32>}, {pipeline_mode = #tpu.pipeline_mode<synchronous>, transform_indices = @transform_2, window_bounds = array<i64: 1, 32>}, {pipeline_mode = #tpu.pipeline_mode<synchronous>, transform_indices = @transform_3, window_bounds = array<i64: 32, 16>}, {pipeline_mode = #tpu.pipeline_mode<synchronous>, transform_indices = @transform_4, window_bounds = array<i64: 1, 16>}, {transform_indices = @transform_5, window_bounds = array<i64: 8, 16>}]} {
    %0 = tpu.iota {dimensions = array<i32: 1>} : vector<8x128xi32>
    %1 = tpu.iota {dimensions = array<i32: 1>} : vector<8x128xi32>
    %c0 = arith.constant 0 : index
    %c0_0 = arith.constant 0 : index
    %2 = vector.load %arg1[%c0, %c0_0] : memref<8x16xi32, #tpu.memory_space<vmem>>, vector<8x1xi32>
    %c0_1 = arith.constant 0 : index
    %c5 = arith.constant 5 : index
    %3 = vector.load %arg1[%c0_1, %c5] : memref<8x16xi32, #tpu.memory_space<vmem>>, vector<8x1xi32>
    %c0_2 = arith.constant 0 : index
    %c10 = arith.constant 10 : index
    %4 = vector.load %arg1[%c0_2, %c10] : memref<8x16xi32, #tpu.memory_space<vmem>>, vector<8x1xi32>
    %5 = vector.broadcast %2 : vector<8x1xi32> to vector<8x128xi32>
    %6 = arith.cmpi eq, %0, %5 : vector<8x128xi32>
    %7 = arith.extui %6 : vector<8x128xi1> to vector<8x128xi32>
    %8 = arith.sitofp %7 : vector<8x128xi32> to vector<8x128xf32>
    %9 = arith.truncf %8 : vector<8x128xf32> to vector<8x128xbf16>
    %c0_3 = arith.constant 0 : index
    %c0_4 = arith.constant 0 : index
    %10 = vector.load %arg7[%c0_3, %c0_4] : memref<8x1280xbf16, #tpu.memory_space<vmem>>, vector<8x128xbf16>
    tpu.vector_store %arg7[%c0_3, %c0_4], %9 {strides = array<i32>} : memref<8x1280xbf16, #tpu.memory_space<vmem>>, vector<8x128xbf16>,
    %11 = vector.broadcast %3 : vector<8x1xi32> to vector<8x128xi32>
    %12 = arith.cmpi eq, %1, %11 : vector<8x128xi32>
    %13 = arith.extui %12 : vector<8x128xi1> to vector<8x128xi32>
    %14 = arith.sitofp %13 : vector<8x128xi32> to vector<8x128xf32>
    %15 = arith.truncf %14 : vector<8x128xf32> to vector<8x128xbf16>
    %16 = vector.broadcast %4 : vector<8x1xi32> to vector<8x128xi32>
    %17 = arith.cmpi eq, %1, %16 : vector<8x128xi32>
    %18 = arith.extui %17 : vector<8x128xi1> to vector<8x128xi32>
    %19 = arith.sitofp %18 : vector<8x128xi32> to vector<8x128xf32>
    %20 = arith.truncf %19 : vector<8x128xf32> to vector<8x128xbf16>
    %21 = arith.addf %15, %20 : vector<8x128xbf16>
    %c0_5 = arith.constant 0 : index
    %c128 = arith.constant 128 : index
    %22 = vector.load %arg7[%c0_5, %c128] : memref<8x1280xbf16, #tpu.memory_space<vmem>>, vector<8x128xbf16>
    tpu.vector_store %arg7[%c0_5, %c128], %21 {strides = array<i32>} : memref<8x1280xbf16, #tpu.memory_space<vmem>>, vector<8x128xbf16>,
    %c0_6 = arith.constant 0 : index
    %c1 = arith.constant 1 : index
    %23 = vector.load %arg1[%c0_6, %c1] : memref<8x16xi32, #tpu.memory_space<vmem>>, vector<8x1xi32>
    %c0_7 = arith.constant 0 : index
    %c6 = arith.constant 6 : index
    %24 = vector.load %arg1[%c0_7, %c6] : memref<8x16xi32, #tpu.memory_space<vmem>>, vector<8x1xi32>
    %c0_8 = arith.constant 0 : index
    %c11 = arith.constant 11 : index
    %25 = vector.load %arg1[%c0_8, %c11] : memref<8x16xi32, #tpu.memory_space<vmem>>, vector<8x1xi32>
    %26 = vector.broadcast %23 : vector<8x1xi32> to vector<8x128xi32>
    %27 = arith.cmpi eq, %0, %26 : vector<8x128xi32>
    %28 = arith.extui %27 : vector<8x128xi1> to vector<8x128xi32>
    %29 = arith.sitofp %28 : vector<8x128xi32> to vector<8x128xf32>
    %30 = arith.truncf %29 : vector<8x128xf32> to vector<8x128xbf16>
    %c0_9 = arith.constant 0 : index
    %c256 = arith.constant 256 : index
    %31 = vector.load %arg7[%c0_9, %c256] : memref<8x1280xbf16, #tpu.memory_space<vmem>>, vector<8x128xbf16>
    tpu.vector_store %arg7[%c0_9, %c256], %30 {strides = array<i32>} : memref<8x1280xbf16, #tpu.memory_space<vmem>>, vector<8x128xbf16>,
    %32 = vector.broadcast %24 : vector<8x1xi32> to vector<8x128xi32>
    %33 = arith.cmpi eq, %1, %32 : vector<8x128xi32>
    %34 = arith.extui %33 : vector<8x128xi1> to vector<8x128xi32>
    %35 = arith.sitofp %34 : vector<8x128xi32> to vector<8x128xf32>
    %36 = arith.truncf %35 : vector<8x128xf32> to vector<8x128xbf16>
    %37 = vector.broadcast %25 : vector<8x1xi32> to vector<8x128xi32>
    %38 = arith.cmpi eq, %1, %37 : vector<8x128xi32>
    %39 = arith.extui %38 : vector<8x128xi1> to vector<8x128xi32>
    %40 = arith.sitofp %39 : vector<8x128xi32> to vector<8x128xf32>
    %41 = arith.truncf %40 : vector<8x128xf32> to vector<8x128xbf16>
    %42 = arith.addf %36, %41 : vector<8x128xbf16>
    %c0_10 = arith.constant 0 : index
    %c384 = arith.constant 384 : index
    %43 = vector.load %arg7[%c0_10, %c384] : memref<8x1280xbf16, #tpu.memory_space<vmem>>, vector<8x128xbf16>
    tpu.vector_store %arg7[%c0_10, %c384], %42 {strides = array<i32>} : memref<8x1280xbf16, #tpu.memory_space<vmem>>, vector<8x128xbf16>,
    %c0_11 = arith.constant 0 : index
    %c2 = arith.constant 2 : index
    %44 = vector.load %arg1[%c0_11, %c2] : memref<8x16xi32, #tpu.memory_space<vmem>>, vector<8x1xi32>
    %c0_12 = arith.constant 0 : index
    %c7 = arith.constant 7 : index
    %45 = vector.load %arg1[%c0_12, %c7] : memref<8x16xi32, #tpu.memory_space<vmem>>, vector<8x1xi32>
    %c0_13 = arith.constant 0 : index
    %c12 = arith.constant 12 : index
    %46 = vector.load %arg1[%c0_13, %c12] : memref<8x16xi32, #tpu.memory_space<vmem>>, vector<8x1xi32>
    %47 = vector.broadcast %44 : vector<8x1xi32> to vector<8x128xi32>
    %48 = arith.cmpi eq, %0, %47 : vector<8x128xi32>
    %49 = arith.extui %48 : vector<8x128xi1> to vector<8x128xi32>
    %50 = arith.sitofp %49 : vector<8x128xi32> to vector<8x128xf32>
    %51 = arith.truncf %50 : vector<8x128xf32> to vector<8x128xbf16>
    %c0_14 = arith.constant 0 : index
    %c512 = arith.constant 512 : index
    %52 = vector.load %arg7[%c0_14, %c512] : memref<8x1280xbf16, #tpu.memory_space<vmem>>, vector<8x128xbf16>
    tpu.vector_store %arg7[%c0_14, %c512], %51 {strides = array<i32>} : memref<8x1280xbf16, #tpu.memory_space<vmem>>, vector<8x128xbf16>,
    %53 = vector.broadcast %45 : vector<8x1xi32> to vector<8x128xi32>
    %54 = arith.cmpi eq, %1, %53 : vector<8x128xi32>
    %55 = arith.extui %54 : vector<8x128xi1> to vector<8x128xi32>
    %56 = arith.sitofp %55 : vector<8x128xi32> to vector<8x128xf32>
    %57 = arith.truncf %56 : vector<8x128xf32> to vector<8x128xbf16>
    %58 = vector.broadcast %46 : vector<8x1xi32> to vector<8x128xi32>
    %59 = arith.cmpi eq, %1, %58 : vector<8x128xi32>
    %60 = arith.extui %59 : vector<8x128xi1> to vector<8x128xi32>
    %61 = arith.sitofp %60 : vector<8x128xi32> to vector<8x128xf32>
    %62 = arith.truncf %61 : vector<8x128xf32> to vector<8x128xbf16>
    %63 = arith.addf %57, %62 : vector<8x128xbf16>
    %c0_15 = arith.constant 0 : index
    %c640 = arith.constant 640 : index
    %64 = vector.load %arg7[%c0_15, %c640] : memref<8x1280xbf16, #tpu.memory_space<vmem>>, vector<8x128xbf16>
    tpu.vector_store %arg7[%c0_15, %c640], %63 {strides = array<i32>} : memref<8x1280xbf16, #tpu.memory_space<vmem>>, vector<8x128xbf16>,
    %c0_16 = arith.constant 0 : index
    %c3 = arith.constant 3 : index
    %65 = vector.load %arg1[%c0_16, %c3] : memref<8x16xi32, #tpu.memory_space<vmem>>, vector<8x1xi32>
    %c0_17 = arith.constant 0 : index
    %c8 = arith.constant 8 : index
    %66 = vector.load %arg1[%c0_17, %c8] : memref<8x16xi32, #tpu.memory_space<vmem>>, vector<8x1xi32>
    %c0_18 = arith.constant 0 : index
    %c13 = arith.constant 13 : index
    %67 = vector.load %arg1[%c0_18, %c13] : memref<8x16xi32, #tpu.memory_space<vmem>>, vector<8x1xi32>
    %68 = vector.broadcast %65 : vector<8x1xi32> to vector<8x128xi32>
    %69 = arith.cmpi eq, %0, %68 : vector<8x128xi32>
    %70 = arith.extui %69 : vector<8x128xi1> to vector<8x128xi32>
    %71 = arith.sitofp %70 : vector<8x128xi32> to vector<8x128xf32>
    %72 = arith.truncf %71 : vector<8x128xf32> to vector<8x128xbf16>
    %c0_19 = arith.constant 0 : index
    %c768 = arith.constant 768 : index
    %73 = vector.load %arg7[%c0_19, %c768] : memref<8x1280xbf16, #tpu.memory_space<vmem>>, vector<8x128xbf16>
    tpu.vector_store %arg7[%c0_19, %c768], %72 {strides = array<i32>} : memref<8x1280xbf16, #tpu.memory_space<vmem>>, vector<8x128xbf16>,
    %74 = vector.broadcast %66 : vector<8x1xi32> to vector<8x128xi32>
    %75 = arith.cmpi eq, %1, %74 : vector<8x128xi32>
    %76 = arith.extui %75 : vector<8x128xi1> to vector<8x128xi32>
    %77 = arith.sitofp %76 : vector<8x128xi32> to vector<8x128xf32>
    %78 = arith.truncf %77 : vector<8x128xf32> to vector<8x128xbf16>
    %79 = vector.broadcast %67 : vector<8x1xi32> to vector<8x128xi32>
    %80 = arith.cmpi eq, %1, %79 : vector<8x128xi32>
    %81 = arith.extui %80 : vector<8x128xi1> to vector<8x128xi32>
    %82 = arith.sitofp %81 : vector<8x128xi32> to vector<8x128xf32>
    %83 = arith.truncf %82 : vector<8x128xf32> to vector<8x128xbf16>
    %84 = arith.addf %78, %83 : vector<8x128xbf16>
    %c0_20 = arith.constant 0 : index
    %c896 = arith.constant 896 : index
    %85 = vector.load %arg7[%c0_20, %c896] : memref<8x1280xbf16, #tpu.memory_space<vmem>>, vector<8x128xbf16>
    tpu.vector_store %arg7[%c0_20, %c896], %84 {strides = array<i32>} : memref<8x1280xbf16, #tpu.memory_space<vmem>>, vector<8x128xbf16>,
    %c0_21 = arith.constant 0 : index
    %c4 = arith.constant 4 : index
    %86 = vector.load %arg1[%c0_21, %c4] : memref<8x16xi32, #tpu.memory_space<vmem>>, vector<8x1xi32>
    %c0_22 = arith.constant 0 : index
    %c9 = arith.constant 9 : index
    %87 = vector.load %arg1[%c0_22, %c9] : memref<8x16xi32, #tpu.memory_space<vmem>>, vector<8x1xi32>
    %c0_23 = arith.constant 0 : index
    %c14 = arith.constant 14 : index
    %88 = vector.load %arg1[%c0_23, %c14] : memref<8x16xi32, #tpu.memory_space<vmem>>, vector<8x1xi32>
    %89 = vector.broadcast %86 : vector<8x1xi32> to vector<8x128xi32>
    %90 = arith.cmpi eq, %0, %89 : vector<8x128xi32>
    %91 = arith.extui %90 : vector<8x128xi1> to vector<8x128xi32>
    %92 = arith.sitofp %91 : vector<8x128xi32> to vector<8x128xf32>
    %93 = arith.truncf %92 : vector<8x128xf32> to vector<8x128xbf16>
    %c0_24 = arith.constant 0 : index
    %c1024 = arith.constant 1024 : index
    %94 = vector.load %arg7[%c0_24, %c1024] : memref<8x1280xbf16, #tpu.memory_space<vmem>>, vector<8x128xbf16>
    tpu.vector_store %arg7[%c0_24, %c1024], %93 {strides = array<i32>} : memref<8x1280xbf16, #tpu.memory_space<vmem>>, vector<8x128xbf16>,
    %95 = vector.broadcast %87 : vector<8x1xi32> to vector<8x128xi32>
    %96 = arith.cmpi eq, %1, %95 : vector<8x128xi32>
    %97 = arith.extui %96 : vector<8x128xi1> to vector<8x128xi32>
    %98 = arith.sitofp %97 : vector<8x128xi32> to vector<8x128xf32>
    %99 = arith.truncf %98 : vector<8x128xf32> to vector<8x128xbf16>
    %100 = vector.broadcast %88 : vector<8x1xi32> to vector<8x128xi32>
    %101 = arith.cmpi eq, %1, %100 : vector<8x128xi32>
    %102 = arith.extui %101 : vector<8x128xi1> to vector<8x128xi32>
    %103 = arith.sitofp %102 : vector<8x128xi32> to vector<8x128xf32>
    %104 = arith.truncf %103 : vector<8x128xf32> to vector<8x128xbf16>
    %105 = arith.addf %99, %104 : vector<8x128xbf16>
    %c0_25 = arith.constant 0 : index
    %c1152 = arith.constant 1152 : index
    %106 = vector.load %arg7[%c0_25, %c1152] : memref<8x1280xbf16, #tpu.memory_space<vmem>>, vector<8x128xbf16>
    tpu.vector_store %arg7[%c0_25, %c1152], %105 {strides = array<i32>} : memref<8x1280xbf16, #tpu.memory_space<vmem>>, vector<8x128xbf16>,
    %c0_26 = arith.constant 0 : index
    %c0_27 = arith.constant 0 : index
    %107 = vector.load %arg7[%c0_26, %c0_27] : memref<8x1280xbf16, #tpu.memory_space<vmem>>, vector<8x1280xbf16>
    %c0_28 = arith.constant 0 : index
    %c0_29 = arith.constant 0 : index
    %108 = vector.load %arg2[%c0_28, %c0_29] : memref<1280x32xbf16, #tpu.memory_space<vmem>>, vector<1280x32xbf16>
    %cst = arith.constant dense<0.000000e+00> : vector<8x32xf32>
    %109 = tpu.matmul %107, %108, %cst {dimension_numbers = #tpu.dot_dimension_numbers<[1], [0], [0], [1], [0, 0, 1, 1], [], []>} : vector<8x1280xbf16>, vector<1280x32xbf16>, vector<8x32xf32> -> vector<8x32xf32>
    %c0_30 = arith.constant 0 : index
    %c0_31 = arith.constant 0 : index
    %110 = vector.load %arg3[%c0_30, %c0_31] : memref<1x32xf32, #tpu.memory_space<vmem>>, vector<1x32xf32>
    %111 = vector.broadcast %110 : vector<1x32xf32> to vector<8x32xf32>
    %112 = arith.addf %109, %111 : vector<8x32xf32>
    %113 = math.tanh %112 : vector<8x32xf32>
    %c0_32 = arith.constant 0 : index
    %c0_33 = arith.constant 0 : index
    %114 = vector.load %arg4[%c0_32, %c0_33] : memref<32x16xf32, #tpu.memory_space<vmem>>, vector<32x16xf32>
    %cst_34 = arith.constant dense<0.000000e+00> : vector<8x16xf32>
    %115 = tpu.matmul %113, %114, %cst_34 {dimension_numbers = #tpu.dot_dimension_numbers<[1], [0], [0], [1], [0, 0, 1, 1], [], []>} : vector<8x32xf32>, vector<32x16xf32>, vector<8x16xf32> -> vector<8x16xf32>
    %c0_35 = arith.constant 0 : index
    %c0_36 = arith.constant 0 : index
    %116 = vector.load %arg5[%c0_35, %c0_36] : memref<1x16xf32, #tpu.memory_space<vmem>>, vector<1x16xf32>
    %117 = vector.broadcast %116 : vector<1x16xf32> to vector<8x16xf32>
    %118 = arith.addf %115, %117 : vector<8x16xf32>
    %cst_37 = arith.constant dense<0xFF800000> : vector<8xf32>
    %119 = vector.multi_reduction <maximumf>, %118, %cst_37 [1] : vector<8x16xf32> to vector<8xf32>
    %120 = vector.shape_cast %119 : vector<8xf32> to vector<8x1xf32>
    %121 = vector.broadcast %120 : vector<8x1xf32> to vector<8x16xf32>
    %122 = arith.subf %118, %121 : vector<8x16xf32>
    %123 = math.exp %122 : vector<8x16xf32>
    %cst_38 = arith.constant dense<0.000000e+00> : vector<8xf32>
    %124 = vector.multi_reduction <add>, %123, %cst_38 [1] : vector<8x16xf32> to vector<8xf32>
    %125 = vector.shape_cast %124 : vector<8xf32> to vector<8x1xf32>
    %126 = math.log %125 : vector<8x1xf32>
    %127 = vector.broadcast %126 : vector<8x1xf32> to vector<8x16xf32>
    %128 = arith.subf %122, %127 : vector<8x16xf32>
    %c0_39 = arith.constant 0 : index
    %c0_40 = arith.constant 0 : index
    %129 = vector.load %arg6[%c0_39, %c0_40] : memref<8x16xf32, #tpu.memory_space<vmem>>, vector<8x16xf32>
    tpu.vector_store %arg6[%c0_39, %c0_40], %128 {strides = array<i32>} : memref<8x16xf32, #tpu.memory_space<vmem>>, vector<8x16xf32>,
    return
  }
  func.func @transform_0(%arg0: i32) -> (i32, i32) {
    %c0_i32 = arith.constant 0 : i32
    %c0_i32_0 = arith.constant 0 : i32
    return %arg0, %c0_i32 : i32, i32
  }
  func.func @transform_1(%arg0: i32) -> (i32, i32) {
    %c0_i32 = arith.constant 0 : i32
    %c0_i32_0 = arith.constant 0 : i32
    %c0_i32_1 = arith.constant 0 : i32
    return %c0_i32, %c0_i32_0 : i32, i32
  }
  func.func @transform_2(%arg0: i32) -> (i32, i32) {
    %c0_i32 = arith.constant 0 : i32
    %c0_i32_0 = arith.constant 0 : i32
    %c0_i32_1 = arith.constant 0 : i32
    return %c0_i32, %c0_i32_0 : i32, i32
  }
  func.func @transform_3(%arg0: i32) -> (i32, i32) {
    %c0_i32 = arith.constant 0 : i32
    %c0_i32_0 = arith.constant 0 : i32
    %c0_i32_1 = arith.constant 0 : i32
    return %c0_i32, %c0_i32_0 : i32, i32
  }
  func.func @transform_4(%arg0: i32) -> (i32, i32) {
    %c0_i32 = arith.constant 0 : i32
    %c0_i32_0 = arith.constant 0 : i32
    %c0_i32_1 = arith.constant 0 : i32
    return %c0_i32, %c0_i32_0 : i32, i32
  }
  func.func @transform_5(%arg0: i32) -> (i32, i32) {
    %c0_i32 = arith.constant 0 : i32
    %c0_i32_0 = arith.constant 0 : i32
    return %arg0, %c0_i32 : i32, i32
  }
}

</mosaic_0001>

<bundles_post_ra>
// kernel: tpu_custom_call.1
= control target key start
LH: loop header
LB: loop body
LE: loop exit
PB: predicated region body
PF: predicated region fallthrough
CT: control target
= control target key end

     0   :  { %v1536_v2 = vmov 5   ;;  %v1537_v3 = vmov 0   ;;  %v1538_v6 = vmov 6   ;;  %v1539_v7 = vmov 10   ;;  %s1905_s0 = inlined_call_operand.vmem [shape: s32[8,16], index: 0, kind: input, shape index: {}]   ;;  %s1906_s1 = inlined_call_operand.vmem [shape: bf16[1280,32], index: 1, kind: input, shape index: {}]   ;;  %s1907_s2 = inlined_call_operand.vmem [shape: f32[1,32], index: 2, kind: input, shape index: {}]   ;;  %s1908_s3 = inlined_call_operand.vmem [shape: f32[32,16], index: 3, kind: input, shape index: {}]   ;;  %s1909_s4 = inlined_call_operand.vmem [shape: f32[1,16], index: 4, kind: input, shape index: {}]   ;;  %s1910_s5 = inlined_call_operand.hbm [shape: f32[8,16], index: 5, kind: output, shape index: {}]  }
   0x1   :  { %v1587_v0 = vld [vmem:[%s1905_s0] sm:$0xff]  ;;  %v1418_v1 = vld [vmem:[%s1906_s1 + $0x78] sm:$0xff]   ;;  %1402 = vset.pattern.permute.xlu0 %v1536_v2  ;;  %1404 = vset.pattern.permute.xlu1 %v1537_v3  ;;  %v1420_v5 = vld [vmem:[%s1906_s1 + $0x70] sm:$0xff]   ;;  %v1540_v13 = vmov 11   ;;  %v1541_v14 = vmov 1   ;;  %v1542_v20 = vmov 7  }
   0x2   :  { %26 = vperm.xlu1 %1404, %v1587_v0   ;;  %34 = vperm.xlu0 %1402, %v1587_v0   ;;  %v1419_v4 = vld [vmem:[%s1906_s1 + $0x38] sm:$0xff]   ;;  %v1421_v8 = vld [vmem:[%s1906_s1 + $0x30] sm:$0xff]   ;;  %v1424_v11 = vld [vmem:[%s1906_s1 + $0x68] sm:$0xff]   ;;  %v1543_v21 = vmov 2   ;;  %v1544_v27 = vmov 12   ;;  %v1545_v28 = vmov 3  }
   0x3   :  { %1258 = vmatprep.subr.bf16.mxu0 %v1418_v1  ;;  %v1422_v9 = vld [vmem:[%s1906_s1 + $0xf8] sm:$0xff]   ;;  %v1425_v12 = vld [vmem:[%s1906_s1 + $0x28] sm:$0xff]   ;;  %v1426_v15 = vld [vmem:[%s1906_s1 + $0xf0] sm:$0xff]   ;;  %v1546_v34 = vmov 8   ;;  %v1547_v35 = vmov 4   ;;  %v1548_v41 = vmov 13  }
   0x4   :  { %1259 = vmatpush3.bf16.msra.mxu0 %v1419_v4  ;;  %v1423_v10 = vld [vmem:[%s1906_s1 + $0xb8] sm:$0xff]   ;;  %1280 = vmatprep.subr.bf16.mxu1 %v1422_v9  ;;  %v1427_v16 = vld [vmem:[%s1906_s1 + $0xb0] sm:$0xff]   ;;  %v1428_v17 = vld [vmem:[%s1906_s1 + $0x60] sm:$0xff]   ;;  %v1549_v43 = vmov 14   ;;  %v1550_v47 = vmov 9  }
   0x5   :  { %1260 = vmatprep.subr.bf16.mxu0 %v1420_v5  ;;  %1281 = vmatpush3.bf16.msra.mxu1 %v1423_v10  ;;  %v1429_v18 = vld [vmem:[%s1906_s1 + $0x20] sm:$0xff]   ;;  %v1430_v19 = vld [vmem:[%s1906_s1 + $0xe8] sm:$0xff]   ;;  %v1432_v23 = vld [vmem:[%s1906_s1 + $0x58] sm:$0xff]  }
   0x6   :  { %1405 = vset.pattern.permute.xlu1 %v1538_v6  ;;  %1403 = vset.pattern.permute.xlu0 %v1539_v7  ;;  %v1431_v22 = vld [vmem:[%s1906_s1 + $0xa8] sm:$0xff]   ;;  %v1433_v24 = vld [vmem:[%s1906_s1 + $0x18] sm:$0xff]   ;;  %v1434_v25 = vld [vmem:[%s1906_s1 + $0xe0] sm:$0xff]  }
   0x7   :  { %59 = vperm.xlu1 %1405, %v1587_v0   ;;  %41 = vperm.xlu0 %1403, %v1587_v0   ;;  %v1435_v26 = vld [vmem:[%s1906_s1 + $0xa0] sm:$0xff]   ;;  %v1436_v29 = vld [vmem:[%s1906_s1 + $0x50] sm:$0xff]   ;;  %v1438_v31 = vld [vmem:[%s1906_s1 + $0xd8] sm:$0xff]  }
   0x8   :  { %1261 = vmatpush3.bf16.msra.mxu0 %v1421_v8  ;;  %1282 = vmatprep.subr.bf16.mxu1 %v1426_v15  ;;  %v1437_v30 = vld [vmem:[%s1906_s1 + $0x10] sm:$0xff]   ;;  %v1439_v32 = vld [vmem:[%s1906_s1 + $0x98] sm:$0xff]   ;;  %v1440_v33 = vld [vmem:[%s1906_s1 + $0x48] sm:$0xff]  }
   0x9   :  { %1262 = vmatprep.subr.bf16.mxu0 %v1424_v11  ;;  %1283 = vmatpush3.bf16.msra.mxu1 %v1427_v16  ;;  %v1441_v36 = vld [vmem:[%s1906_s1 + $0x8] sm:$0xff]   ;;  %v1442_v37 = vld [vmem:[%s1906_s1 + $0xd0] sm:$0xff]   ;;  %v1444_v39 = vld [vmem:[%s1906_s1 + $0x40] sm:$0xff]  }
   0xa   :  { %1284 = vmatprep.subr.bf16.mxu1 %v1430_v19  ;;  %v1443_v38 = vld [vmem:[%s1906_s1 + $0x90] sm:$0xff]   ;;  %v1445_v40 = vld [vmem:[%s1906_s1] sm:$0xff]   ;;  %v1446_v42 = vld [vmem:[%s1906_s1 + $0xc8] sm:$0xff]  }
   0xb   :  { %1406 = vset.pattern.permute.xlu1 %v1540_v13  ;;  %1407 = vset.pattern.permute.xlu0 %v1541_v14  ;;  %v1447_v44 = vld [vmem:[%s1906_s1 + $0x88] sm:$0xff]   ;;  %v1450_v45 = vld [vmem:[%s1906_s1 + $0x178] sm:$0xff]   ;;  %v1451_v46 = vld [vmem:[%s1906_s1 + $0xc0] sm:$0xff]  }
   0xc   :  { %66 = vperm.xlu1 %1406, %v1587_v0   ;;  %51 = vperm.xlu0 %1407, %v1587_v0   ;;  %v1453_v48 = vld [vmem:[%s1906_s1 + $0x80] sm:$0xff]   ;;  %v1458_v49 = vld [vmem:[%s1906_s1 + $0x1f8] sm:$0xff]  }
   0xd   :  { %1263 = vmatpush3.bf16.msra.mxu0 %v1425_v12  ;;  %1285 = vmatpush3.bf16.msra.mxu1 %v1431_v22 }
   0xe   :  { %1264 = vmatprep.subr.bf16.mxu0 %v1428_v17  ;;  %1286 = vmatprep.subr.bf16.mxu1 %v1434_v25 }
  0x10   :  { %1408 = vset.pattern.permute.xlu1 %v1542_v20  ;;  %1410 = vset.pattern.permute.xlu0 %v1543_v21 }
  0x11   :  { %84 = vperm.xlu1 %1408, %v1587_v0   ;;  %76 = vperm.xlu0 %1410, %v1587_v0  }
  0x12   :  { %1265 = vmatpush3.bf16.msra.mxu0 %v1429_v18  ;;  %1287 = vmatpush3.bf16.msra.mxu1 %v1435_v26 }
  0x13   :  { %1266 = vmatprep.subr.bf16.mxu0 %v1432_v23  ;;  %1288 = vmatprep.subr.bf16.mxu1 %v1438_v31 }
  0x15   :  { %1409 = vset.pattern.permute.xlu1 %v1544_v27  ;;  %1413 = vset.pattern.permute.xlu0 %v1545_v28 }
  0x16   :  { %91 = vperm.xlu1 %1409, %v1587_v0   ;;  %101 = vperm.xlu0 %1413, %v1587_v0  }
  0x17   :  { %1267 = vmatpush3.bf16.msra.mxu0 %v1433_v24  ;;  %1289 = vmatpush3.bf16.msra.mxu1 %v1439_v32 }
  0x18   :  { %1268 = vmatprep.subr.bf16.mxu0 %v1436_v29  ;;  %1290 = vmatprep.subr.bf16.mxu1 %v1442_v37 }
  0x1a   :  { %1411 = vset.pattern.permute.xlu1 %v1546_v34  ;;  %1416 = vset.pattern.permute.xlu0 %v1547_v35 }
  0x1b   :  { %109 = vperm.xlu1 %1411, %v1587_v0   ;;  %126 = vperm.xlu0 %1416, %v1587_v0  }
  0x1c   :  { %1269 = vmatpush3.bf16.msra.mxu0 %v1437_v30  ;;  %1291 = vmatpush3.bf16.msra.mxu1 %v1443_v38 }
  0x1d   :  { %1270 = vmatprep.subr.bf16.mxu0 %v1440_v33  ;;  %1292 = vmatprep.subr.bf16.mxu1 %v1446_v42 }
  0x1f   :  { %1412 = vset.pattern.permute.xlu1 %v1548_v41  ;;  %1417 = vset.pattern.permute.xlu0 %v1549_v43 }
  0x20   :  { %116 = vperm.xlu1 %1412, %v1587_v0   ;;  %1271 = vmatpush3.bf16.msra.mxu0 %v1441_v36 }
  0x21   :  { %1272 = vmatprep.subr.bf16.mxu0 %v1444_v39  ;;  %1293 = vmatpush3.bf16.msra.mxu1 %v1447_v44 }
  0x22   :  { %1294 = vmatprep.subr.bf16.mxu1 %v1451_v46 }
  0x24   :  { %1414 = vset.pattern.permute.xlu1 %v1550_v47  ;;  %1273 = vmatpush3.bf16.msra.mxu0 %v1445_v40 }
  0x25   :  { %134 = vperm.xlu1 %1414, %v1587_v0   ;;  %1302 = vmatprep.subr.bf16.mxu0 %v1450_v45 }
  0x26   :  { %1295 = vmatpush3.bf16.msra.mxu1 %v1453_v48 }
  0x27   :  { %1324 = vmatprep.subr.bf16.mxu1 %v1458_v49 }
  0x29   :  { %1415 = vset.pattern.permute.xlu1 %v1549_v43 }
  0x2a   :  { %141 = vperm.xlu1 %1415, %v1587_v0  }
  0x2b   :  { %10 = vsyncpa [#allocation4], 0  ;;  %v22_v50 = vlaneseq  ;;  %v1551_v54 = vmov 0.0   ;;  %v1452_v17 = vld [vmem:[%s1906_s1 + $0x138] sm:$0xff]   ;;  %v1454_v20 = vld [vmem:[%s1906_s1 + $0x170] sm:$0xff]   ;;  %vm1552_vm15 = vmmov 0  }
  0x2c   :  { %v1457_v27 = vld [vmem:[%s1906_s1 + $0x130] sm:$0xff]   ;;  %v1459_v30 = vld [vmem:[%s1906_s1 + $0x1b8] sm:$0xff]   ;;  %v1460_v31 = vld [vmem:[%s1906_s1 + $0x168] sm:$0xff]  }
  0x2d   :  { %v1706_v51 = vand.u32 127, %v22_v50  ;;  %v1462_v35 = vld [vmem:[%s1906_s1 + $0x1f0] sm:$0xff]   ;;  %v1461_v37 = vld [vmem:[%s1906_s1 + $0x128] sm:$0xff]   ;;  %v1464_v41 = vld [vmem:[%s1906_s1 + $0x160] sm:$0xff]  }
  0x2e   :  { %v1463_v40 = vld [vmem:[%s1906_s1 + $0x1b0] sm:$0xff]   ;;  %v1466_v42 = vld [vmem:[%s1906_s1 + $0x1e8] sm:$0xff]   ;;  %v1465_v45 = vld [vmem:[%s1906_s1 + $0x120] sm:$0xff]  }
  0x2f   :  { %v1467_v47 = vld [vmem:[%s1906_s1 + $0x1a8] sm:$0xff]   ;;  %v1468_v48 = vld [vmem:[%s1906_s1 + $0x158] sm:$0xff]   ;;  %v1470_v50 = vld [vmem:[%s1906_s1 + $0x1e0] sm:$0xff]  }
  0x7d   :  { %v35_v52 = vpop.permute.xlu0 %34  ;;  %v27_v53 = vpop.permute.xlu1 %26 }
  0x7e   :  { %vm28_vm0 = vcmp.eq.s32.totalorder %v1706_v51, %v27_v53  ;;  %vm36_vm1 = vcmp.eq.s32.totalorder %v1706_v51, %v35_v52 }
  0x7f   :  { %v1150_v55 = vsel %vm28_vm0, 1.0, %v1551_v54  ;;  %v1151_v57 = vsel %vm36_vm1, 1.0, %v1551_v54  ;;  %vm1048_vm0 = vcmask 261120   ;;  %vm1122_vm1 = vcmask 130048  }
  0x80   :  { %v31_v56 = vpack.c.bf16 %v1150_v55, %v1150_v55  ;;  %v39_v61 = vpack.c.bf16 %v1151_v57, %v1151_v57  ;;  %v1469_v57 = vld [vmem:[%s1906_s1 + $0x118] sm:$0xff]  }
  0x82   :  { %32 = vst [vmem:[#allocation2] sm:$0xf] %v31_v56  ;;  %v42_v58 = vpop.permute.xlu0 %41  ;;  %v60_v59 = vpop.permute.xlu1 %59 }
  0x83   :  { %vm43_vm2 = vcmp.eq.s32.totalorder %v1706_v51, %v42_v58  ;;  %vm61_vm3 = vcmp.eq.s32.totalorder %v1706_v51, %v60_v59  ;;  %v1471_v58 = vld [vmem:[%s1906_s1 + $0x1a0] sm:$0xff]   ;;  %v1472_v59 = vld [vmem:[%s1906_s1 + $0x150] sm:$0xff]  }
  0x84   :  { %v1152_v60 = vsel %vm43_vm2, 1.0, %v1551_v54  ;;  %v1154_v63 = vsel %vm61_vm3, 1.0, %v1551_v54 }
  0x85   :  { %v46_v62 = vpack.c.bf16 %v1152_v60, %v1152_v60  ;;  %v64_v3 = vpack.c.bf16 %v1154_v63, %v1154_v63  ;;  %v1474_v60 = vld [vmem:[%s1906_s1 + $0x1d8] sm:$0xff]  }
  0x87   :  { %v47_v0 = vadd.bf16 %v46_v62, %v39_v61  ;;  %v67_v1 = vpop.permute.xlu1 %66  ;;  %v52_v2 = vpop.permute.xlu0 %51  ;;  %v1473_v62 = vld [vmem:[%s1906_s1 + $0x110] sm:$0xff]  }
  0x88   :  { %vm68_vm4 = vcmp.eq.s32.totalorder %v1706_v51, %v67_v1  ;;  %vm53_vm5 = vcmp.eq.s32.totalorder %v1706_v51, %v52_v2  ;;  %v1476_v1 = vld [vmem:[%s1906_s1 + $0x148] sm:$0xff]  }
  0x89   :  { %48 = vst [vmem:[#allocation2 + $0x4] sm:$0xf] %v47_v0  ;;  %v1155_v4 = vsel %vm68_vm4, 1.0, %v1551_v54  ;;  %v1153_v5 = vsel %vm53_vm5, 1.0, %v1551_v54  ;;  %v1475_v0 = vld [vmem:[%s1906_s1 + $0x198] sm:$0xff]  }
  0x8a   :  { %v71_v6 = vpack.c.bf16 %v1155_v4, %v1155_v4  ;;  %v56_v7 = vpack.c.bf16 %v1153_v5, %v1153_v5 }
  0x8c   :  { %v72_v8 = vadd.bf16 %v71_v6, %v64_v3  ;;  %57 = vst [vmem:[#allocation2 + $0x8] sm:$0xf] %v56_v7  ;;  %v85_v9 = vpop.permute.xlu1 %84  ;;  %v77_v10 = vpop.permute.xlu0 %76  ;;  %v1478_v3 = vld [vmem:[%s1906_s1 + $0x1d0] sm:$0xff]   ;;  %v1477_v6 = vld [vmem:[%s1906_s1 + $0x108] sm:$0xff]  }
  0x8d   :  { %vm86_vm6 = vcmp.eq.s32.totalorder %v1706_v51, %v85_v9  ;;  %vm78_vm7 = vcmp.eq.s32.totalorder %v1706_v51, %v77_v10 }
  0x8e   :  { %73 = vst [vmem:[#allocation2 + $0xc] sm:$0xf] %v72_v8  ;;  %v1156_v11 = vsel %vm78_vm7, 1.0, %v1551_v54  ;;  %v1157_v12 = vsel %vm86_vm6, 1.0, %v1551_v54  ;;  %v1482_v8 = vld [vmem:[%s1906_s1 + $0x140] sm:$0xff]  }
  0x8f   :  { %v81_v13 = vpack.c.bf16 %v1156_v11, %v1156_v11  ;;  %v89_v21 = vpack.c.bf16 %v1157_v12, %v1157_v12  ;;  %v1484_v11 = vld [vmem:[%s1906_s1 + $0x1c8] sm:$0xff]   ;;  %v1483_v12 = vld [vmem:[%s1906_s1 + $0x100] sm:$0xff]  }
  0x90   :  { %v149_v14 = vld [vmem:[#allocation2] sm:$0xff] }
  0x91   :  { %v1166_v15 = vcombine.low %v149_v14, %v149_v14  ;;  %v1167_v16 = vcombine.high %v149_v14, %v149_v14  ;;  %v92_v18 = vpop.permute.xlu1 %91  ;;  %82 = vst [vmem:[#allocation2 + $0x10] sm:$0xf] %v81_v13  ;;  %v102_v19 = vpop.permute.xlu0 %101  ;;  %v1485_v13 = vld [vmem:[%s1906_s1 + $0x188] sm:$0xff]   ;;  %v1486_v14 = vld [vmem:[%s1906_s1 + $0x278] sm:$0xff]  }
  0x92   :  { %vm93_vm8 = vcmp.eq.s32.totalorder %v1706_v51, %v92_v18  ;;  %vm103_vm9 = vcmp.eq.s32.totalorder %v1706_v51, %v102_v19  ;;  %v1489_v18 = vld [vmem:[%s1906_s1 + $0x180] sm:$0xff]   ;;  %v1492_v19 = vld [vmem:[%s1906_s1 + $0x270] sm:$0xff]  }
  0x93   :  { %868 = vmatprep.mubr.bf16.mxu0 %v1167_v16  ;;  %v1158_v22 = vsel %vm93_vm8, 1.0, %v1551_v54  ;;  %v1159_v23 = vsel %vm103_vm9, 1.0, %v1551_v54  ;;  %v1488_v16 = vld [vmem:[%s1906_s1 + $0x238] sm:$0xff]  }
  0x94   :  { %869 = vmatmul.mubr.bf16.vlgmr.msra.gmra.mxu0 %v1166_v15  ;;  %v96_v24 = vpack.c.bf16 %v1158_v22, %v1158_v22  ;;  %v106_v25 = vpack.c.bf16 %v1159_v23, %v1159_v23  ;;  %v1487_v15 = vld [vmem:[%s1906_s1 + $0x1c0] sm:$0xff]   ;;  %v1493_v23 = vld [vmem:[%s1906_s1 + $0x230] sm:$0xff]  }
  0x95   :  { %1303 = vmatpush3.bf16.msra.mxu0 %v1452_v17  ;;  %v150_v26 = vld [vmem:[#allocation2 + $0x8] sm:$0xff] }
  0x96   :  { %1304 = vmatprep.subr.bf16.mxu0 %v1454_v20  ;;  %v1168_v28 = vcombine.low %v150_v26, %v150_v26  ;;  %v1169_v29 = vcombine.high %v150_v26, %v150_v26  ;;  %v97_v32 = vadd.bf16 %v96_v24, %v89_v21  ;;  %v110_v33 = vpop.permute.xlu1 %109  ;;  %107 = vst [vmem:[#allocation2 + $0x18] sm:$0xf] %v106_v25  ;;  %v127_v34 = vpop.permute.xlu0 %126  ;;  %v1494_v24 = vld [vmem:[%s1906_s1 + $0x268] sm:$0xff]   ;;  %v1496_v26 = vld [vmem:[%s1906_s1 + $0x260] sm:$0xff]  }
  0x97   :  { %vm111_vm10 = vcmp.eq.s32.totalorder %v1706_v51, %v110_v33  ;;  %vm128_vm11 = vcmp.eq.s32.totalorder %v1706_v51, %v127_v34  ;;  %v1495_v25 = vld [vmem:[%s1906_s1 + $0x228] sm:$0xff]   ;;  %v1506_v34 = vld [vmem:[%s1906_s1 + $0x240] sm:$0xff]  }
  0x98   :  { %908 = vmatprep.mubr.bf16.mxu1 %v1169_v29  ;;  %98 = vst [vmem:[#allocation2 + $0x14] sm:$0xf] %v97_v32  ;;  %v1162_v36 = vsel %vm128_vm11, 1.0, %v1551_v54  ;;  %v1160_v38 = vsel %vm111_vm10, 1.0, %v1551_v54  ;;  %v1499_v29 = vld [vmem:[%s1906_s1 + $0x218] sm:$0xff]   ;;  %v1502_v32 = vld [vmem:[%s1906_s1 + $0x248] sm:$0xff]  }
  0x99   :  { %1305 = vmatpush3.bf16.msra.mxu0 %v1457_v27  ;;  %909 = vmatmul.mubr.bf16.vlgmr.msra.gmra.mxu1 %v1168_v28  ;;  %v131_v39 = vpack.c.bf16 %v1162_v36, %v1162_v36  ;;  %v114_v44 = vpack.c.bf16 %v1160_v38, %v1160_v38  ;;  %v1497_v27 = vld [vmem:[%s1906_s1 + $0x220] sm:$0xff]   ;;  %v1498_v28 = vld [vmem:[%s1906_s1 + $0x258] sm:$0xff]   ;;  %v1503_v33 = vld [vmem:[%s1906_s1 + $0x208] sm:$0xff]  }
  0x9a   :  { %1325 = vmatpush3.bf16.msra.mxu1 %v1459_v30  ;;  %1306 = vmatprep.subr.bf16.mxu0 %v1460_v31  ;;  %v1500_v30 = vld [vmem:[%s1906_s1 + $0x250] sm:$0xff]  }
  0x9b   :  { %1326 = vmatprep.subr.bf16.mxu1 %v1462_v35  ;;  %v117_v43 = vpop.permute.xlu1 %116  ;;  %132 = vst [vmem:[#allocation2 + $0x20] sm:$0xf] %v131_v39  ;;  %v1501_v31 = vld [vmem:[%s1906_s1 + $0x210] sm:$0xff]   ;;  %v1507_v35 = vld [vmem:[%s1906_s1 + $0x200] sm:$0xff]   ;;  %v1038_v39 = vld [vmem:[%s1908_s3 + $0x8] sm:$0xff] }
  0x9c   :  { %vm118_vm12 = vcmp.eq.s32.totalorder %v1706_v51, %v117_v43  ;;  %v1039_v38 = vld [vmem:[%s1908_s3 + $0x10] sm:$0xff] }
  0x9d   :  { %1307 = vmatpush3.bf16.msra.mxu0 %v1461_v37  ;;  %v1161_v46 = vsel %vm118_vm12, 1.0, %v1551_v54  ;;  %v1040_v37 = vld [vmem:[%s1908_s3 + $0x18] sm:$0xff] }
  0x9e   :  { %1327 = vmatpush3.bf16.msra.mxu1 %v1463_v40  ;;  %1308 = vmatprep.subr.bf16.mxu0 %v1464_v41  ;;  %v121_v49 = vpack.c.bf16 %v1161_v46, %v1161_v46  ;;  %v1037_v40 = vld [vmem:[%s1908_s3] sm:$0xff] }
  0x9f   :  { %1328 = vmatprep.subr.bf16.mxu1 %v1466_v42  ;;  %v151_v52 = vld [vmem:[#allocation2 + $0x10] sm:$0xff] }
  0xa0   :  { %v122_v53 = vadd.bf16 %v121_v49, %v114_v44  ;;  %v1171_v55 = vcombine.high %v151_v52, %v151_v52  ;;  %v135_v56 = vpop.permute.xlu1 %134  ;;  %v1170_v17 = vcombine.low %v151_v52, %v151_v52 }
  0xa1   :  { %1309 = vmatpush3.bf16.msra.mxu0 %v1465_v45  ;;  %vm136_vm13 = vcmp.eq.s32.totalorder %v1706_v51, %v135_v56 }
  0xa2   :  { %1329 = vmatpush3.bf16.msra.mxu1 %v1467_v47  ;;  %1310 = vmatprep.subr.bf16.mxu0 %v1468_v48  ;;  %123 = vst [vmem:[#allocation2 + $0x1c] sm:$0xf] %v122_v53  ;;  %v1163_v61 = vsel %vm136_vm13, 1.0, %v1551_v54 }
  0xa3   :  { %1330 = vmatprep.subr.bf16.mxu1 %v1470_v50  ;;  %948 = vmatprep.mubr.bf16.mxu0 %v1171_v55  ;;  %v139_v2 = vpack.c.bf16 %v1163_v61, %v1163_v61 }
  0xa5   :  { %1311 = vmatpush3.bf16.msra.mxu0 %v1469_v57  ;;  %v142_v63 = vpop.permute.xlu1 %141 }
  0xa6   :  { %1331 = vmatpush3.bf16.msra.mxu1 %v1471_v58  ;;  %1312 = vmatprep.subr.bf16.mxu0 %v1472_v59  ;;  %vm143_vm14 = vcmp.eq.s32.totalorder %v1706_v51, %v142_v63  ;;  %v1479_v51 = vld [vmem:[%s1906_s1 + $0x190] sm:$0xff]  }
  0xa7   :  { %1332 = vmatprep.subr.bf16.mxu1 %v1474_v60  ;;  %v1164_v4 = vsel %vm143_vm14, 1.0, %v1551_v54 }
  0xa8   :  { %v146_v5 = vpack.c.bf16 %v1164_v4, %v1164_v4 }
  0xa9   :  { %1313 = vmatpush3.bf16.msra.mxu0 %v1473_v62  ;;  %v152_v7 = vld [vmem:[#allocation2 + $0x18] sm:$0xff] }
  0xaa   :  { %1333 = vmatpush3.bf16.msra.mxu1 %v1475_v0  ;;  %1314 = vmatprep.subr.bf16.mxu0 %v1476_v1  ;;  %v1173_v9 = vcombine.high %v152_v7, %v152_v7  ;;  %v147_v10 = vadd.bf16 %v146_v5, %v139_v2  ;;  %v1172_v22 = vcombine.low %v152_v7, %v152_v7 }
  0xab   :  { %1334 = vmatprep.subr.bf16.mxu1 %v1478_v3 }
  0xac   :  { %988 = vmatprep.mubr.bf16.mxu1 %v1173_v9  ;;  %148 = vst [vmem:[#allocation2 + $0x24] sm:$0xf] %v147_v10  ;;  %v1256_v9 = vld [vmem:[%s1909_s4] ss:$0 sm:$0xff] }
  0xad   :  { %1315 = vmatpush3.bf16.msra.mxu0 %v1477_v6 }
  0xae   :  { %1335 = vmatpush3.bf16.msra.mxu1 %v1479_v51  ;;  %1316 = vmatprep.subr.bf16.mxu0 %v1482_v8 }
  0xaf   :  { %1336 = vmatprep.subr.bf16.mxu1 %v1484_v11 }
  0xb1   :  { %1317 = vmatpush3.bf16.msra.mxu0 %v1483_v12 }
  0xb2   :  { %1337 = vmatpush3.bf16.msra.mxu1 %v1485_v13  ;;  %1346 = vmatprep.subr.bf16.mxu0 %v1486_v14 }
  0xb3   :  { %1338 = vmatprep.subr.bf16.mxu1 %v1487_v15  ;;  %v153_v20 = vld [vmem:[#allocation2 + $0x20] sm:$0xff] }
  0xb4   :  { %949 = vmatmul.mubr.bf16.vlgmr.msra.gmra.mxu0 %v1170_v17  ;;  %v1175_v21 = vcombine.high %v153_v20, %v153_v20  ;;  %v1174_v36 = vcombine.low %v153_v20, %v153_v20 }
  0xb5   :  { %1347 = vmatpush3.bf16.msra.mxu0 %v1488_v16 }
  0xb6   :  { %1339 = vmatpush3.bf16.msra.mxu1 %v1489_v18  ;;  %1348 = vmatprep.subr.bf16.mxu0 %v1492_v19 }
  0xb7   :  { %1028 = vmatprep.mubr.bf16.mxu0 %v1175_v21  ;;  %1373 = vmatprep.subr.mxu1 %v1551_v54 }
  0xb9   :  { %989 = vmatmul.mubr.bf16.vlgmr.msra.gmra.mxu1 %v1172_v22  ;;  %1349 = vmatpush3.bf16.msra.mxu0 %v1493_v23 }
  0xba   :  { %1350 = vmatprep.subr.bf16.mxu0 %v1494_v24  ;;  %1374 = vmatpush3.msra.mxu1 %v1040_v37 }
  0xbb   :  { %1381 = vmatprep.mubr.msk.f32.mxu1 %vm1552_vm15, %v1551_v54  ;;  %1375 = vmatprep.subr.mxu1 %v1551_v54 }
  0xbc   :  { %1376 = vmatpush3.msra.mxu1 %v1039_v38 }
  0xbd   :  { %1351 = vmatpush3.bf16.msra.mxu0 %v1495_v25  ;;  %1377 = vmatprep.subr.mxu1 %v1551_v54 }
  0xbe   :  { %1352 = vmatprep.subr.bf16.mxu0 %v1496_v26  ;;  %1378 = vmatpush3.msra.mxu1 %v1038_v39 }
  0xbf   :  { %1379 = vmatprep.subr.mxu1 %v1551_v54  ;;  %v1165_v54 = vld [vmem:[%s1907_s2] ss:$0 sm:$0xff]  ;;  %s1553_s2 = smov [#allocation3]  }
  0xc0   :  { %1380 = vmatpush3.msra.mxu1 %v1037_v40  ;;  %s1142_s4 = sshll.u32 %s1553_s2, 4  ;;  %s1143_s4 = int_to_ptr.vmem [resolvable:$true] %s1142_s4 }
  0xc1   :  { %1353 = vmatpush3.bf16.msra.mxu0 %v1497_v27  ;;  %s1514_s8 = scalar_lea.vmem %s1143_s4, 128  ;;  %p1519_p1 = scmp.lt.s32.totalorder %s1143_s4, %s1143_s4 }
  0xc2   :  { %1354 = vmatprep.subr.bf16.mxu0 %v1498_v28  ;;  %p1515_p0 = scmp.ne.s32.totalorder %s1143_s4, %s1514_s8  ;;  %p1520_p2 = scmp.lt.s32.totalorder %s1514_s8, %s1514_s8 }
  0xc4   :  { %p1521_p3 = por %p1520_p2, %p1519_p1 }
  0xc5   :  { %1355 = vmatpush3.bf16.msra.mxu0 %v1499_v29 }
  0xc6   :  { %1356 = vmatprep.subr.bf16.mxu0 %v1500_v30  ;;  %p1522_p4 = pnand %p1521_p3, %p1515_p0 }
  0xc9   :  { %1357 = vmatpush3.bf16.msra.mxu0 %v1501_v31 }
  0xca   :  { %1358 = vmatprep.subr.bf16.mxu0 %v1502_v32 }
  0xcd   :  { %1359 = vmatpush3.bf16.msra.mxu0 %v1503_v33 }
  0xce   :  { %1360 = vmatprep.subr.bf16.mxu0 %v1506_v34 }
  0xd1   :  { %1361 = vmatpush3.bf16.msra.mxu0 %v1507_v35 }
  0xd4   :  { %1029 = vmatmul.mubr.bf16.vlgmr.msra.gmra.mxu0 %v1174_v36 }
 0x154   :  { %v1274_v41 = vpop.f32.mrf.mxu0 }
 0x156   :  { %v1275_v42 = vpop.f32.mrf.mxu0 }
 0x157   :  { %v1276_v59 = vadd.f32 %v1275_v42, %v1274_v41 }
 0x158   :  { %v1277_v43 = vpop.f32.mrf.mxu0 }
 0x159   :  { %v1296_v44 = vpop.f32.mrf.mxu1  ;;  %v871_v61 = vadd.f32 %v1276_v59, %v1165_v54 }
 0x15a   :  { %v1278_v45 = vpop.f32.mrf.mxu0 }
 0x15b   :  { %v1297_v46 = vpop.f32.mrf.mxu1 }
 0x15c   :  { %v1298_v60 = vadd.f32 %v1297_v46, %v1296_v44 }
 0x15d   :  { %v1299_v47 = vpop.f32.mrf.mxu1 }
 0x15e   :  { %v911_v63 = vadd.f32 %v1298_v60, %v871_v61 }
 0x15f   :  { %v1300_v48 = vpop.f32.mrf.mxu1 }
 0x174   :  { %v1318_v49 = vpop.f32.mrf.mxu0 }
 0x176   :  { %v1319_v50 = vpop.f32.mrf.mxu0 }
 0x177   :  { %v1320_v62 = vadd.f32 %v1319_v50, %v1318_v49 }
 0x178   :  { %v1321_v52 = vpop.f32.mrf.mxu0 }
 0x179   :  { %v1340_v53 = vpop.f32.mrf.mxu1  ;;  %v951_v2 = vadd.f32 %v1320_v62, %v911_v63 }
 0x17a   :  { %v1322_v55 = vpop.f32.mrf.mxu0 }
 0x17b   :  { %v1341_v56 = vpop.f32.mrf.mxu1 }
 0x17c   :  { %v1342_v0 = vadd.f32 %v1341_v56, %v1340_v53 }
 0x17d   :  { %v1343_v57 = vpop.f32.mrf.mxu1 }
 0x17e   :  { %v991_v4 = vadd.f32 %v1342_v0, %v951_v2 }
 0x17f   :  { %v1344_v58 = vpop.f32.mrf.mxu1 }
 0x194   :  { %v1362_v1 = vpop.f32.mrf.mxu0 }
 0x196   :  { %v1363_v3 = vpop.f32.mrf.mxu0 }
 0x197   :  { %v1364_v5 = vadd.f32 %v1363_v3, %v1362_v1 }
 0x198   :  { %v1365_v6 = vpop.f32.mrf.mxu0 }
 0x199   :  { %v1031_v7 = vadd.f32 %v1364_v5, %v991_v4 }
 0x19a   :  { %v1366_v51 = vpop.f32.mrf.mxu0 }
 0x19b   :  { %1508 = vtanh.f32 %v1031_v7 }
 0x1a8   :  { %v1509_v8 = vpop.eup %1508 }
 0x1a9   :  { %1382 = vmatmul.mubr.msk.f32.vlgmr.msra.gmra.mxu1 %vm1048_vm0, %v1509_v8 }
 0x269   :  { %v1118_v10 = vpop.f32.mrf.mxu1 }
 0x26a   :  { %v1119_v11 = vadd.f32 %v1256_v9, %v1118_v10 }
 0x26b   :  { %v1383_v12 = vpop.f32.mrf.mxu1 }
 0x26c   :  { %v1123_v13 = vsel %vm1122_vm1, %v1119_v11, -inf }
 0x26d   :  { %1124 = vmax.xlane.f32.xlu1 %v1123_v13 }
 0x2f6   :  { %v1125_v14 = vpop.xlane.xlu1 %1124 }
 0x2f7   :  { %v1126_v15 = vsub.f32 %v1119_v11, %v1125_v14 }
 0x2f9   :  { %v1127_v16 = vmul.f32 1.442695, %v1126_v15 }
 0x2fb   :  { %1510 = vpow2.f32 %v1127_v16 }
 0x308   :  { %v1511_v17 = vpop.eup %1510 }
 0x309   :  { %v1129_v18 = vsel %vm1122_vm1, %v1511_v17, 0.0 }
 0x30a   :  { %1130 = vadd.xlane.f32.xlu0 %v1129_v18 }
 0x393   :  { %v1131_v19 = vpop.xlane.xlu0 %1130 }
 0x394   :  { %1512 = vlog2.f32 %v1131_v19 }
 0x3a1   :  { %v1513_v20 = vpop.eup %1512 }
 0x3a2   :  { %v1133_v21 = vmul.f32 0.6931472, %v1513_v20 }
 0x3a4   :  { %v1134_v22 = vsub.f32 %v1126_v15, %v1133_v21 }
 0x3a6   :  { %1135 = vst.msk [vmem:[#allocation3] sm:$0xff] %vm1122_vm1, %v1134_v22 }
 0x3a7   :  { %1525 = shalt.err (!%p1522_p4)
}
 0x3a8   :  { %1145 = dma.vmem_to_hbm [thread:$0]  %s1143_s4, 128, %s1910_s5, [#allocation4]  }
 0x3a9   :  { %1534 = dma.done.wait [#allocation4], 128  }
 0x3aa   :  { %1535 = vsyncadd [#allocation4], 4294967168 }
 0x3ab   :  { %1149 = vsyncpa [#allocation4], 1 }

</bundles_post_ra>
